<compile_context>
chip_gen: v5e
topology: v5e:2x2
jax: 0.10.0
libtpu: 0.0.40
codegen_flags: <defaults>
</compile_context>

<pallas_src>
import jax
import jax.numpy as jnp
from jax.experimental import pallas as pl
from jax.experimental.pallas import tpu as pltpu


# ----------------------------------------------------------------------------
# Standalone elementwise Swish kernel  (the `Swish` nn.Module)
# ----------------------------------------------------------------------------

_LANES = 128
_SMALL_FAST_PATH = 1 << 18  # below ~256K elements plain XLA beats launch cost


def _swish_kernel_trainable(beta_ref, x_ref, o_ref):
    # beta_ref: (1, 1) f32 in SMEM; math kept in f32 (matches PyTorch, where the
    # trainable beta is f32); cast only at the final store.
    x = x_ref[...].astype(jnp.float32)
    beta = beta_ref[0, 0]
    o_ref[...] = (x * jax.nn.sigmoid(beta * x)).astype(o_ref.dtype)


def _make_swish_kernel_const(beta):
    beta = float(beta)  # compile-time constant: no SMEM operand, no scalar load

    def kernel(x_ref, o_ref):
        x = x_ref[...].astype(jnp.float32)
        o_ref[...] = (x * jax.nn.sigmoid(beta * x)).astype(o_ref.dtype)

    return kernel


def _choose_swish_tiling(n, max_tile_rows):
    """Return (padded_rows, tile_rows).  Avoid padding whenever possible."""
    start = max(8, max_tile_rows - (max_tile_rows % 8))
    if n % _LANES == 0:
        n_rows = n // _LANES
        if n_rows <= max_tile_rows:               # single full-array block
            return n_rows, n_rows
        for cand in range(start, 7, -8):          # largest divisor, multiple of 8
            if n_rows % cand == 0:
                return n_rows, cand
        tile_rows = start                         # rare: pad a few rows
        return pl.cdiv(n_rows, tile_rows) * tile_rows, tile_rows
    # ragged flat size: pad the tail
    n_rows = pl.cdiv(n, _LANES)
    tile_rows = min(start, max(8, ((n_rows + 7) // 8) * 8))
    return pl.cdiv(n_rows, tile_rows) * tile_rows, tile_rows


def swish(x, beta=1.0, trainable_beta=False, max_tile_rows=1024):
    """Elementwise Swish: x * sigmoid(beta * x), any shape / dtype."""
    n = x.size
    if n == 0:
        return x
    if n < _SMALL_FAST_PATH:
        # small-tensor fast path: fused XLA elementwise beats kernel overhead
        xf = x.astype(jnp.float32)
        b = jnp.asarray(beta, dtype=jnp.float32)
        return (xf * jax.nn.sigmoid(b * xf)).astype(x.dtype)

    orig_shape = x.shape
    padded_rows, tile_rows = _choose_swish_tiling(n, max_tile_rows)
    needs_pad = (padded_rows * _LANES != n)

    x_flat = jnp.reshape(x, (-1,))
    if needs_pad:
        x_flat = jnp.pad(x_flat, (0, padded_rows * _LANES - n))
    x2d = jnp.reshape(x_flat, (padded_rows, _LANES))

    x_spec = pl.BlockSpec((tile_rows, _LANES), lambda i: (i, 0))
    out_spec = pl.BlockSpec((tile_rows, _LANES), lambda i: (i, 0))

    if trainable_beta:
        kernel = _swish_kernel_trainable
        beta_arr = jnp.asarray(beta, dtype=jnp.float32).reshape(1, 1)
        args = (beta_arr, x2d)
        in_specs = [pl.BlockSpec(memory_space=pltpu.SMEM), x_spec]
    else:
        kernel = _make_swish_kernel_const(beta)
        args = (x2d,)
        in_specs = [x_spec]

    n_elems = padded_rows * _LANES
    itemsize = jnp.dtype(x.dtype).itemsize
    cost = pl.CostEstimate(flops=2 * n_elems,
                           transcendentals=n_elems,
                           bytes_accessed=2 * n_elems * itemsize)

    out2d = pl.pallas_call(
        kernel,
        out_shape=jax.ShapeDtypeStruct((padded_rows, _LANES), x.dtype),
        grid=(padded_rows // tile_rows,),
        in_specs=in_specs,
        out_specs=out_spec,
        compiler_params=pltpu.CompilerParams(dimension_semantics=("parallel",)),
        cost_estimate=cost,
    )(*args)

    out = jnp.reshape(out2d, (-1,))
    if needs_pad:
        out = out[:n]
    return jnp.reshape(out, orig_shape)


class Swish:
    """Mirror of the PyTorch Swish module."""

    def __init__(self, trainable_beta=False, initial_beta=1.0):
        self.trainable_beta = trainable_beta
        self.beta = jnp.float32(initial_beta) if trainable_beta else float(initial_beta)

    def __call__(self, x):
        return swish(x, beta=self.beta, trainable_beta=self.trainable_beta)


# ----------------------------------------------------------------------------
# ONE fused kernel for the whole VAEclassification forward pass
# ----------------------------------------------------------------------------

def _build_fused_kernel(block_out_dims, block_has_ds, z_dim,
                        trainable_beta, beta_const):
    """Kernel closure over the (compile-time) network structure.

    Ref order:
      [beta_smem?], x, eps,
      (w, c) per ResBlock,                # w already BN/bias-folded; ds blocks
                                          # carry [w*g | wd] concatenated
      w_heads, b_heads,                   # [W_mu | W_logvar] concatenated
      w3, c3, w4, b4,                     # classifier (BN folded into w3/c3)
      logits_out, z_out
    """
    nb = len(block_out_dims)

    def kernel(*refs):
        i = 0
        if trainable_beta:
            beta = refs[i][0, 0]          # f32 scalar from SMEM
            i += 1
        else:
            beta = jnp.float32(beta_const)

        x_ref = refs[i]; i += 1
        eps_ref = refs[i]; i += 1

        h = x_ref[...].astype(jnp.float32)

        # ---- encoder ResBlocks (h stays in vregs/VMEM) ----
        for blk in range(nb):
            w_ref = refs[i]; c_ref = refs[i + 1]; i += 2
            y = jnp.dot(h, w_ref[...], preferred_element_type=jnp.float32)
            y = y + c_ref[...]
            n = block_out_dims[blk]
            if block_has_ds[blk]:
                main = y[:, :n]            # swish branch (fc + folded BN)
                res = y[:, n:]             # spectral-normed downsample branch
            else:
                main = y
                res = h
            s = main * jax.nn.sigmoid(beta * main)
            h = s + res

        # ---- VAE heads + reparameterization ----
        wh_ref = refs[i]; bh_ref = refs[i + 1]; i += 2
        hl = jnp.dot(h, wh_ref[...], preferred_element_type=jnp.float32)
        hl = hl + bh_ref[...]
        mu = hl[:, :z_dim]
        logvar = hl[:, z_dim:]
        z = mu + eps_ref[...].astype(jnp.float32) * jnp.exp(0.5 * logvar)

        # ---- classifier head ----
        w3_ref = refs[i]; c3_ref = refs[i + 1]
        w4_ref = refs[i + 2]; b4_ref = refs[i + 3]; i += 4
        y3 = jnp.dot(z, w3_ref[...], preferred_element_type=jnp.float32)
        y3 = y3 + c3_ref[...]
        s3 = y3 * jax.nn.sigmoid(beta * y3)
        logits = jnp.dot(s3, w4_ref[...], preferred_element_type=jnp.float32)
        logits = logits + b4_ref[...]

        logits_ref = refs[i]
        z_ref = refs[i + 1]
        logits_ref[...] = logits.astype(logits_ref.dtype)
        z_ref[...] = z.astype(z_ref.dtype)

    return kernel


def _choose_bm(m, max_tile=256):
    """Row block size: 8-aligned, capped, and split into >=2 grid steps for
    batches >= 16 so the second TensorCore on v7x gets work."""
    m8 = max(8, ((m + 7) // 8) * 8)
    if m8 <= 8:
        return 8
    if m8 <= max_tile:
        if m8 >= 16:
            return max(8, ((m8 // 2 + 7) // 8) * 8)
        return m8
    return max(8, max_tile - (max_tile % 8))


def _const_spec(shape, single_buffer):
    """Full-array block with a constant index_map (weights / biases)."""
    idx = lambda *i: (0,) * len(shape)
    if single_buffer and hasattr(pl, "Buffered"):
        # Block never changes -> one buffer suffices; halves weight VMEM
        # footprint (matters for large enc_dims on v7x's 64 MiB VMEM).
        return pl.BlockSpec(shape, idx, pipeline_mode=pl.Buffered(1))
    return pl.BlockSpec(shape, idx)


def vae_classification_forward(x, fused, eps, beta, trainable_beta=True,
                               max_tile=256):
    """Full fused forward: returns (class_logits, z), matching PyTorch."""
    m, in_dim = x.shape
    z_dim = fused["z_dim"]
    class_num = fused["w4"].shape[1]
    out_dtype = x.dtype

    bm = _choose_bm(m, max_tile)
    m_pad = pl.cdiv(m, bm) * bm
    if m_pad != m:
        x = jnp.pad(x, ((0, m_pad - m), (0, 0)))
        eps = jnp.pad(eps, ((0, m_pad - m), (0, 0)))

    weight_arrays = []
    for (w, c) in fused["blocks"]:
        weight_arrays += [w, c]
    weight_arrays += [fused["w_heads"], fused["b_heads"],
                      fused["w3"], fused["c3"], fused["w4"], fused["b4"]]
    wts_bytes = sum(int(a.size) * jnp.dtype(a.dtype).itemsize for a in weight_arrays)
    single_buffer = (2 * wts_bytes) > (16 << 20)

    # ---- assemble args / in_specs (order must match the kernel) ----
    args = []
    in_specs = []
    if trainable_beta:
        args.append(jnp.asarray(beta, dtype=jnp.float32).reshape(1, 1))
        in_specs.append(pl.BlockSpec(memory_space=pltpu.SMEM))
    args += [x, eps]
    in_specs += [pl.BlockSpec((bm, in_dim), lambda i: (i, 0)),
                 pl.BlockSpec((bm, z_dim), lambda i: (i, 0))]
    for a in weight_arrays:
        args.append(a)
        in_specs.append(_const_spec(a.shape, single_buffer))

    kernel = _build_fused_kernel(fused["block_out_dims"], fused["block_has_ds"],
                                 z_dim, trainable_beta, float(beta)
                                 if not trainable_beta else 0.0)

    # ---- cost estimate so XLA can schedule around the custom call ----
    flops = 0
    transcendentals = 0
    k = in_dim
    for (w, _), n in zip(fused["blocks"], fused["block_out_dims"]):
        flops += 2 * m_pad * w.shape[0] * w.shape[1]
        transcendentals += m_pad * n            # sigmoid per ResBlock output
        k = n
    flops += 2 * m_pad * fused["w_heads"].shape[0] * fused["w_heads"].shape[1]
    transcendentals += m_pad * z_dim            # exp(0.5*logvar)
    flops += 2 * m_pad * fused["w3"].shape[0] * fused["w3"].shape[1]
    transcendentals += m_pad * fused["w3"].shape[1]
    flops += 2 * m_pad * fused["w4"].shape[0] * fused["w4"].shape[1]
    bytes_accessed = (sum(int(a.size) * jnp.dtype(a.dtype).itemsize for a in args)
                      + m_pad * (class_num + z_dim) * jnp.dtype(out_dtype).itemsize)
    cost = pl.CostEstimate(flops=int(flops), transcendentals=int(transcendentals),
                           bytes_accessed=int(bytes_accessed))

    # ---- VMEM guard (only matters for large enc_dims) ----
    act_bytes = 2 * (bm * (in_dim + 2 * z_dim + class_num)) * 4
    buf_factor = 1 if single_buffer else 2
    vmem_est = act_bytes + buf_factor * wts_bytes + (1 << 20)
    cp_kwargs = dict(dimension_semantics=("parallel",))
    if vmem_est > (32 << 20):
        cp_kwargs["vmem_limit_bytes"] = int(min(vmem_est, 100 << 20))
    compiler_params = pltpu.CompilerParams(**cp_kwargs)

    logits, z = pl.pallas_call(
        kernel,
        out_shape=(jax.ShapeDtypeStruct((m_pad, class_num), out_dtype),
                   jax.ShapeDtypeStruct((m_pad, z_dim), out_dtype)),
        grid=(m_pad // bm,),
        in_specs=in_specs,
        out_specs=(pl.BlockSpec((bm, class_num), lambda i: (i, 0)),
                   pl.BlockSpec((bm, z_dim), lambda i: (i, 0))),
        compiler_params=compiler_params,
        cost_estimate=cost,
    )(*args)

    if m_pad != m:
        logits = logits[:m]
        z = z[:m]
    return logits, z


# ----------------------------------------------------------------------------
# Parameter construction (plain JAX preprocessing: init + spectral norm) and
# fusion prep (BN/bias fold + matmul concatenation)
# ----------------------------------------------------------------------------

def _kaiming(key, out_dim, in_dim):
    return jax.random.normal(key, (out_dim, in_dim), jnp.float32) * jnp.sqrt(2.0 / in_dim)


def _xavier(key, out_dim, in_dim):
    return jax.random.normal(key, (out_dim, in_dim), jnp.float32) * jnp.sqrt(2.0 / (in_dim + out_dim))


def _spectral_normalize(w, key, n_iter=5, eps=1e-12):
    """Power-iteration spectral norm (effective weight PyTorch uses in forward)."""
    u = jax.random.normal(key, (w.shape[0],), dtype=w.dtype)
    u = u / (jnp.linalg.norm(u) + eps)
    v = jnp.zeros((w.shape[1],), dtype=w.dtype)
    for _ in range(n_iter):
        v = w.T @ u
        v = v / (jnp.linalg.norm(v) + eps)
        u = w @ v
        u = u / (jnp.linalg.norm(u) + eps)
    sigma = jnp.dot(u, w @ v)
    return w / sigma


def _bn_affine(n, eps=1e-5):
    """Eval-mode BatchNorm1d folded to scale/shift (default running stats)."""
    gamma = jnp.ones((n,), jnp.float32)
    beta_bn = jnp.zeros((n,), jnp.float32)
    mean = jnp.zeros((n,), jnp.float32)
    var = jnp.ones((n,), jnp.float32)
    scale = gamma / jnp.sqrt(var + eps)
    shift = beta_bn - mean * scale
    return scale, shift


def init_params(key, enc_dims, hidden_dim, z_dim, class_num):
    assert enc_dims[-1] == hidden_dim
    ks = iter(jax.random.split(key, 64))
    blocks = []
    for i in range(len(enc_dims) - 1):
        in_d, out_d = enc_dims[i], enc_dims[i + 1]
        w = _kaiming(next(ks), out_d, in_d)
        b = jax.random.normal(next(ks), (out_d,), jnp.float32) * 0.01
        g, h = _bn_affine(out_d)
        blk = {"w": w.T, "b": b, "g": g, "h": h, "wd": None, "bd": None}
        if in_d != out_d:
            wd = _spectral_normalize(_kaiming(next(ks), out_d, in_d), next(ks))
            bd = jax.random.normal(next(ks), (out_d,), jnp.float32) * 0.01
            blk["wd"] = wd.T
            blk["bd"] = bd
        blocks.append(blk)
    w21 = _spectral_normalize(_xavier(next(ks), z_dim, hidden_dim), next(ks))
    b21 = jax.random.normal(next(ks), (z_dim,), jnp.float32) * 0.01
    w22 = _spectral_normalize(_xavier(next(ks), z_dim, hidden_dim), next(ks))
    b22 = jax.random.normal(next(ks), (z_dim,), jnp.float32) * 0.01
    w3 = _spectral_normalize(_kaiming(next(ks), z_dim // 2, z_dim), next(ks))
    b3 = jax.random.normal(next(ks), (z_dim // 2,), jnp.float32) * 0.01
    g3, h3 = _bn_affine(z_dim // 2)
    w4 = _spectral_normalize(_xavier(next(ks), class_num, z_dim // 2), next(ks))
    b4 = jax.random.normal(next(ks), (class_num,), jnp.float32) * 0.01
    return {"blocks": blocks,
            "w_mu": w21.T, "b_mu": b21, "w_lv": w22.T, "b_lv": b22,
            "w3": w3.T, "b3": b3, "g3": g3, "h3": h3, "w4": w4.T, "b4": b4}


def prepare_fused_params(params, z_dim):
    """Fold eval-mode BN + bias into weights and concatenate paired matmuls."""
    blocks = []
    out_dims = []
    has_ds = []
    for blk in params["blocks"]:
        w = blk["w"] * blk["g"][None, :]            # column-scale by BN scale
        c = blk["b"] * blk["g"] + blk["h"]          # folded bias + BN shift
        n = w.shape[1]
        if blk["wd"] is not None:
            w = jnp.concatenate([w, blk["wd"]], axis=1)   # (k, 2n)
            c = jnp.concatenate([c, blk["bd"]])           # (2n,)
            has_ds.append(True)
        else:
            has_ds.append(False)
        out_dims.append(n)
        blocks.append((w, c.reshape(1, -1)))
    w_heads = jnp.concatenate([params["w_mu"], params["w_lv"]], axis=1)  # (hid, 2z)
    b_heads = jnp.concatenate([params["b_mu"], params["b_lv"]]).reshape(1, -1)
    w3 = params["w3"] * params["g3"][None, :]
    c3 = (params["b3"] * params["g3"] + params["h3"]).reshape(1, -1)
    return {"blocks": blocks,
            "block_out_dims": tuple(out_dims),
            "block_has_ds": tuple(has_ds),
            "w_heads": w_heads, "b_heads": b_heads,
            "w3": w3, "c3": c3,
            "w4": params["w4"], "b4": params["b4"].reshape(1, -1),
            "z_dim": z_dim}


# ----------------------------------------------------------------------------
# Pure-JAX reference (high-precision matmuls, unfolded layers)
# ----------------------------------------------------------------------------

def reference_forward(x, params, eps, beta):
    hp = jax.lax.Precision.HIGHEST
    h = x
    for blk in params["blocks"]:
        y = jnp.dot(h, blk["w"], precision=hp) + blk["b"]
        y = y * blk["g"] + blk["h"]
        s = y * jax.nn.sigmoid(beta * y)
        r = h if blk["wd"] is None else jnp.dot(h, blk["wd"], precision=hp) + blk["bd"]
        h = s + r
    mu = jnp.dot(h, params["w_mu"], precision=hp) + params["b_mu"]
    lv = jnp.dot(h, params["w_lv"], precision=hp) + params["b_lv"]
    z = mu + eps * jnp.exp(0.5 * lv)
    y = jnp.dot(z, params["w3"], precision=hp) + params["b3"]
    y = y * params["g3"] + params["h3"]
    s = y * jax.nn.sigmoid(beta * y)
    logits = jnp.dot(s, params["w4"], precision=hp) + params["b4"]
    return logits, z


# ----------------------------------------------------------------------------
# Demo / self-test
# ----------------------------------------------------------------------------

if __name__ == "__main__":
    key = jax.random.PRNGKey(0)
    k_param, k_x, k_eps, k_big = jax.random.split(key, 4)

    BATCH = 8
    ENC_DIMS = [32, 32, 16]        # Encoder_layer_dims
    HIDDEN = ENC_DIMS[-1]          # hidden_dim_layer_out_Z
    Z_DIM = 8
    CLASS_NUM = 5
    BETA = 1.0                     # Swish(trainable_beta=True, initial_beta=1.0)

    params = init_params(k_param, ENC_DIMS, HIDDEN, Z_DIM, CLASS_NUM)
    fused = prepare_fused_params(params, Z_DIM)
    x = jax.random.normal(k_x, (BATCH, ENC_DIMS[0]), dtype=jnp.float32)
    eps = jax.random.normal(k_eps, (BATCH, Z_DIM), dtype=jnp.float32)

    logits, z = vae_classification_forward(x, fused, eps, BETA, trainable_beta=True)
    logits, z = jax.block_until_ready((logits, z))

    ref_logits, ref_z = reference_forward(x, params, eps, BETA)
    assert logits.shape == (BATCH, CLASS_NUM) and z.shape == (BATCH, Z_DIM)
    assert logits.dtype == x.dtype and z.dtype == x.dtype
    assert jnp.allclose(logits, ref_logits, rtol=2e-3, atol=2e-3), "logits mismatch"
    assert jnp.allclose(z, ref_z, rtol=2e-3, atol=2e-3), "z mismatch"

    # Exercise an odd (padded) batch as well to check the row-padding path.
    x_odd = jax.random.normal(k_x, (11, ENC_DIMS[0]), dtype=jnp.float32)
    eps_odd = jax.random.normal(k_eps, (11, Z_DIM), dtype=jnp.float32)
    lo, zo = vae_classification_forward(x_odd, fused, eps_odd, BETA, trainable_beta=True)
    lo, zo = jax.block_until_ready((lo, zo))
    ref_lo, ref_zo = reference_forward(x_odd, params, eps_odd, BETA)
    assert lo.shape == (11, CLASS_NUM) and zo.shape == (11, Z_DIM)
    assert jnp.allclose(lo, ref_lo, rtol=2e-3, atol=2e-3), "padded logits mismatch"
    assert jnp.allclose(zo, ref_zo, rtol=2e-3, atol=2e-3), "padded z mismatch"

    # Standalone (memory-bound) Swish kernel above the small-tensor fast-path
    # threshold: 8*8*128*64 = 524288 elems, no padding, 1024-row tiles.
    swish_mod = Swish(trainable_beta=True, initial_beta=1.0)
    xb = jax.random.normal(k_big, (8, 8, 128, 64), dtype=jnp.float32)
    yb = jax.block_until_ready(swish_mod(xb))
    ref_yb = xb * jax.nn.sigmoid(1.0 * xb)
    assert yb.shape == xb.shape and yb.dtype == xb.dtype
    assert jnp.max(jnp.abs(yb - ref_yb)) < 1e-5

    print("KERNEL_OK")
</pallas_src>

<mosaic_0001>
module attributes {stable_mosaic.version = 11 : i64} {
  func.func @kernel(%arg0: i32, %arg1: memref<1x1xf32, #tpu.memory_space<smem>>, %arg2: memref<8x32xf32, #tpu.memory_space<vmem>>, %arg3: memref<8x8xf32, #tpu.memory_space<vmem>>, %arg4: memref<32x32xf32, #tpu.memory_space<vmem>>, %arg5: memref<1x32xf32, #tpu.memory_space<vmem>>, %arg6: memref<32x32xf32, #tpu.memory_space<vmem>>, %arg7: memref<1x32xf32, #tpu.memory_space<vmem>>, %arg8: memref<16x16xf32, #tpu.memory_space<vmem>>, %arg9: memref<1x16xf32, #tpu.memory_space<vmem>>, %arg10: memref<8x4xf32, #tpu.memory_space<vmem>>, %arg11: memref<1x4xf32, #tpu.memory_space<vmem>>, %arg12: memref<4x5xf32, #tpu.memory_space<vmem>>, %arg13: memref<1x5xf32, #tpu.memory_space<vmem>>, %arg14: memref<8x5xf32, #tpu.memory_space<vmem>>, %arg15: memref<8x8xf32, #tpu.memory_space<vmem>>) attributes {dimension_semantics = [#tpu.dimension_semantics<parallel>], iteration_bounds = array<i64: 1>, scalar_prefetch = 0 : i64, scratch_operands = 0 : i64, tpu.core_type = #tpu.core_type<tc>, window_params = [{transform_indices = @transform_0, window_bounds = array<i64: 1, 1>}, {transform_indices = @transform_1, window_bounds = array<i64: 8, 32>}, {transform_indices = @transform_2, window_bounds = array<i64: 8, 8>}, {pipeline_mode = #tpu.pipeline_mode<synchronous>, transform_indices = @transform_3, window_bounds = array<i64: 32, 32>}, {pipeline_mode = #tpu.pipeline_mode<synchronous>, transform_indices = @transform_4, window_bounds = array<i64: 1, 32>}, {pipeline_mode = #tpu.pipeline_mode<synchronous>, transform_indices = @transform_5, window_bounds = array<i64: 32, 32>}, {pipeline_mode = #tpu.pipeline_mode<synchronous>, transform_indices = @transform_6, window_bounds = array<i64: 1, 32>}, {pipeline_mode = #tpu.pipeline_mode<synchronous>, transform_indices = @transform_7, window_bounds = array<i64: 16, 16>}, {pipeline_mode = #tpu.pipeline_mode<synchronous>, transform_indices = @transform_8, window_bounds = array<i64: 1, 16>}, {pipeline_mode = #tpu.pipeline_mode<synchronous>, transform_indices = @transform_9, window_bounds = array<i64: 8, 4>}, {pipeline_mode = #tpu.pipeline_mode<synchronous>, transform_indices = @transform_10, window_bounds = array<i64: 1, 4>}, {pipeline_mode = #tpu.pipeline_mode<synchronous>, transform_indices = @transform_11, window_bounds = array<i64: 4, 5>}, {pipeline_mode = #tpu.pipeline_mode<synchronous>, transform_indices = @transform_12, window_bounds = array<i64: 1, 5>}, {transform_indices = @transform_13, window_bounds = array<i64: 8, 5>}, {transform_indices = @transform_14, window_bounds = array<i64: 8, 8>}]} {
    %c0 = arith.constant 0 : index
    %c0_0 = arith.constant 0 : index
    %0 = memref.load %arg1[%c0, %c0_0] : memref<1x1xf32, #tpu.memory_space<smem>>
    %c0_1 = arith.constant 0 : index
    %c0_2 = arith.constant 0 : index
    %1 = vector.load %arg2[%c0_1, %c0_2] : memref<8x32xf32, #tpu.memory_space<vmem>>, vector<8x32xf32>
    %c0_3 = arith.constant 0 : index
    %c0_4 = arith.constant 0 : index
    %2 = vector.load %arg4[%c0_3, %c0_4] : memref<32x32xf32, #tpu.memory_space<vmem>>, vector<32x32xf32>
    %cst = arith.constant dense<0.000000e+00> : vector<8x32xf32>
    %3 = tpu.matmul %1, %2, %cst {dimension_numbers = #tpu.dot_dimension_numbers<[1], [0], [0], [1], [0, 0, 1, 1], [], []>} : vector<8x32xf32>, vector<32x32xf32>, vector<8x32xf32> -> vector<8x32xf32>
    %c0_5 = arith.constant 0 : index
    %c0_6 = arith.constant 0 : index
    %4 = vector.load %arg5[%c0_5, %c0_6] : memref<1x32xf32, #tpu.memory_space<vmem>>, vector<1x32xf32>
    %5 = vector.broadcast %4 : vector<1x32xf32> to vector<8x32xf32>
    %6 = arith.addf %3, %5 : vector<8x32xf32>
    %7 = vector.broadcast %0 : f32 to vector<8x32xf32>
    %8 = arith.mulf %7, %6 : vector<8x32xf32>
    %9 = arith.negf %8 : vector<8x32xf32>
    %10 = math.exp %9 : vector<8x32xf32>
    %cst_7 = arith.constant 1.000000e+00 : f32
    %11 = vector.broadcast %cst_7 : f32 to vector<8x32xf32>
    %12 = arith.addf %11, %10 : vector<8x32xf32>
    %13 = arith.divf %11, %12 : vector<8x32xf32>
    %14 = arith.mulf %6, %13 : vector<8x32xf32>
    %15 = arith.addf %14, %1 : vector<8x32xf32>
    %c0_8 = arith.constant 0 : index
    %c0_9 = arith.constant 0 : index
    %16 = vector.load %arg6[%c0_8, %c0_9] : memref<32x32xf32, #tpu.memory_space<vmem>>, vector<32x32xf32>
    %cst_10 = arith.constant dense<0.000000e+00> : vector<8x32xf32>
    %17 = tpu.matmul %15, %16, %cst_10 {dimension_numbers = #tpu.dot_dimension_numbers<[1], [0], [0], [1], [0, 0, 1, 1], [], []>} : vector<8x32xf32>, vector<32x32xf32>, vector<8x32xf32> -> vector<8x32xf32>
    %c0_11 = arith.constant 0 : index
    %c0_12 = arith.constant 0 : index
    %18 = vector.load %arg7[%c0_11, %c0_12] : memref<1x32xf32, #tpu.memory_space<vmem>>, vector<1x32xf32>
    %19 = vector.broadcast %18 : vector<1x32xf32> to vector<8x32xf32>
    %20 = arith.addf %17, %19 : vector<8x32xf32>
    %21 = vector.extract_strided_slice %20 {offsets = [0, 0], sizes = [8, 16], strides = [1, 1]} : vector<8x32xf32> to vector<8x16xf32>
    %22 = vector.extract_strided_slice %20 {offsets = [0, 16], sizes = [8, 16], strides = [1, 1]} : vector<8x32xf32> to vector<8x16xf32>
    %23 = vector.broadcast %0 : f32 to vector<8x16xf32>
    %24 = arith.mulf %23, %21 : vector<8x16xf32>
    %25 = arith.negf %24 : vector<8x16xf32>
    %26 = math.exp %25 : vector<8x16xf32>
    %cst_13 = arith.constant 1.000000e+00 : f32
    %27 = vector.broadcast %cst_13 : f32 to vector<8x16xf32>
    %28 = arith.addf %27, %26 : vector<8x16xf32>
    %29 = arith.divf %27, %28 : vector<8x16xf32>
    %30 = arith.mulf %21, %29 : vector<8x16xf32>
    %31 = arith.addf %30, %22 : vector<8x16xf32>
    %c0_14 = arith.constant 0 : index
    %c0_15 = arith.constant 0 : index
    %32 = vector.load %arg8[%c0_14, %c0_15] : memref<16x16xf32, #tpu.memory_space<vmem>>, vector<16x16xf32>
    %cst_16 = arith.constant dense<0.000000e+00> : vector<8x16xf32>
    %33 = tpu.matmul %31, %32, %cst_16 {dimension_numbers = #tpu.dot_dimension_numbers<[1], [0], [0], [1], [0, 0, 1, 1], [], []>} : vector<8x16xf32>, vector<16x16xf32>, vector<8x16xf32> -> vector<8x16xf32>
    %c0_17 = arith.constant 0 : index
    %c0_18 = arith.constant 0 : index
    %34 = vector.load %arg9[%c0_17, %c0_18] : memref<1x16xf32, #tpu.memory_space<vmem>>, vector<1x16xf32>
    %35 = vector.broadcast %34 : vector<1x16xf32> to vector<8x16xf32>
    %36 = arith.addf %33, %35 : vector<8x16xf32>
    %37 = vector.extract_strided_slice %36 {offsets = [0, 0], sizes = [8, 8], strides = [1, 1]} : vector<8x16xf32> to vector<8x8xf32>
    %38 = vector.extract_strided_slice %36 {offsets = [0, 8], sizes = [8, 8], strides = [1, 1]} : vector<8x16xf32> to vector<8x8xf32>
    %c0_19 = arith.constant 0 : index
    %c0_20 = arith.constant 0 : index
    %39 = vector.load %arg3[%c0_19, %c0_20] : memref<8x8xf32, #tpu.memory_space<vmem>>, vector<8x8xf32>
    %cst_21 = arith.constant 5.000000e-01 : f32
    %40 = vector.broadcast %cst_21 : f32 to vector<8x8xf32>
    %41 = arith.mulf %40, %38 : vector<8x8xf32>
    %42 = math.exp %41 : vector<8x8xf32>
    %43 = arith.mulf %39, %42 : vector<8x8xf32>
    %44 = arith.addf %37, %43 : vector<8x8xf32>
    %c0_22 = arith.constant 0 : index
    %c0_23 = arith.constant 0 : index
    %45 = vector.load %arg10[%c0_22, %c0_23] : memref<8x4xf32, #tpu.memory_space<vmem>>, vector<8x4xf32>
    %cst_24 = arith.constant dense<0.000000e+00> : vector<8x4xf32>
    %46 = tpu.matmul %44, %45, %cst_24 {dimension_numbers = #tpu.dot_dimension_numbers<[1], [0], [0], [1], [0, 0, 1, 1], [], []>} : vector<8x8xf32>, vector<8x4xf32>, vector<8x4xf32> -> vector<8x4xf32>
    %c0_25 = arith.constant 0 : index
    %c0_26 = arith.constant 0 : index
    %47 = vector.load %arg11[%c0_25, %c0_26] : memref<1x4xf32, #tpu.memory_space<vmem>>, vector<1x4xf32>
    %48 = vector.broadcast %47 : vector<1x4xf32> to vector<8x4xf32>
    %49 = arith.addf %46, %48 : vector<8x4xf32>
    %50 = vector.broadcast %0 : f32 to vector<8x4xf32>
    %51 = arith.mulf %50, %49 : vector<8x4xf32>
    %52 = arith.negf %51 : vector<8x4xf32>
    %53 = math.exp %52 : vector<8x4xf32>
    %cst_27 = arith.constant 1.000000e+00 : f32
    %54 = vector.broadcast %cst_27 : f32 to vector<8x4xf32>
    %55 = arith.addf %54, %53 : vector<8x4xf32>
    %56 = arith.divf %54, %55 : vector<8x4xf32>
    %57 = arith.mulf %49, %56 : vector<8x4xf32>
    %c0_28 = arith.constant 0 : index
    %c0_29 = arith.constant 0 : index
    %58 = vector.load %arg12[%c0_28, %c0_29] : memref<4x5xf32, #tpu.memory_space<vmem>>, vector<4x5xf32>
    %cst_30 = arith.constant dense<0.000000e+00> : vector<8x5xf32>
    %59 = tpu.matmul %57, %58, %cst_30 {dimension_numbers = #tpu.dot_dimension_numbers<[1], [0], [0], [1], [0, 0, 1, 1], [], []>} : vector<8x4xf32>, vector<4x5xf32>, vector<8x5xf32> -> vector<8x5xf32>
    %c0_31 = arith.constant 0 : index
    %c0_32 = arith.constant 0 : index
    %60 = vector.load %arg13[%c0_31, %c0_32] : memref<1x5xf32, #tpu.memory_space<vmem>>, vector<1x5xf32>
    %61 = vector.broadcast %60 : vector<1x5xf32> to vector<8x5xf32>
    %62 = arith.addf %59, %61 : vector<8x5xf32>
    %c0_33 = arith.constant 0 : index
    %c0_34 = arith.constant 0 : index
    %63 = vector.load %arg14[%c0_33, %c0_34] : memref<8x5xf32, #tpu.memory_space<vmem>>, vector<8x5xf32>
    tpu.vector_store %arg14[%c0_33, %c0_34], %62 {strides = array<i32>} : memref<8x5xf32, #tpu.memory_space<vmem>>, vector<8x5xf32>,
    %c0_35 = arith.constant 0 : index
    %c0_36 = arith.constant 0 : index
    %64 = vector.load %arg15[%c0_35, %c0_36] : memref<8x8xf32, #tpu.memory_space<vmem>>, vector<8x8xf32>
    tpu.vector_store %arg15[%c0_35, %c0_36], %44 {strides = array<i32>} : memref<8x8xf32, #tpu.memory_space<vmem>>, vector<8x8xf32>,
    return
  }
  func.func @transform_0(%arg0: i32) -> (i32, i32) {
    %c0_i32 = arith.constant 0 : i32
    %c0_i32_0 = arith.constant 0 : i32
    %c0_i32_1 = arith.constant 0 : i32
    return %c0_i32, %c0_i32_0 : i32, i32
  }
  func.func @transform_1(%arg0: i32) -> (i32, i32) {
    %c0_i32 = arith.constant 0 : i32
    %c0_i32_0 = arith.constant 0 : i32
    return %arg0, %c0_i32 : i32, i32
  }
  func.func @transform_2(%arg0: i32) -> (i32, i32) {
    %c0_i32 = arith.constant 0 : i32
    %c0_i32_0 = arith.constant 0 : i32
    return %arg0, %c0_i32 : i32, i32
  }
  func.func @transform_3(%arg0: i32) -> (i32, i32) {
    %c0_i32 = arith.constant 0 : i32
    %c0_i32_0 = arith.constant 0 : i32
    %c0_i32_1 = arith.constant 0 : i32
    return %c0_i32, %c0_i32_0 : i32, i32
  }
  func.func @transform_4(%arg0: i32) -> (i32, i32) {
    %c0_i32 = arith.constant 0 : i32
    %c0_i32_0 = arith.constant 0 : i32
    %c0_i32_1 = arith.constant 0 : i32
    return %c0_i32, %c0_i32_0 : i32, i32
  }
  func.func @transform_5(%arg0: i32) -> (i32, i32) {
    %c0_i32 = arith.constant 0 : i32
    %c0_i32_0 = arith.constant 0 : i32
    %c0_i32_1 = arith.constant 0 : i32
    return %c0_i32, %c0_i32_0 : i32, i32
  }
  func.func @transform_6(%arg0: i32) -> (i32, i32) {
    %c0_i32 = arith.constant 0 : i32
    %c0_i32_0 = arith.constant 0 : i32
    %c0_i32_1 = arith.constant 0 : i32
    return %c0_i32, %c0_i32_0 : i32, i32
  }
  func.func @transform_7(%arg0: i32) -> (i32, i32) {
    %c0_i32 = arith.constant 0 : i32
    %c0_i32_0 = arith.constant 0 : i32
    %c0_i32_1 = arith.constant 0 : i32
    return %c0_i32, %c0_i32_0 : i32, i32
  }
  func.func @transform_8(%arg0: i32) -> (i32, i32) {
    %c0_i32 = arith.constant 0 : i32
    %c0_i32_0 = arith.constant 0 : i32
    %c0_i32_1 = arith.constant 0 : i32
    return %c0_i32, %c0_i32_0 : i32, i32
  }
  func.func @transform_9(%arg0: i32) -> (i32, i32) {
    %c0_i32 = arith.constant 0 : i32
    %c0_i32_0 = arith.constant 0 : i32
    %c0_i32_1 = arith.constant 0 : i32
    return %c0_i32, %c0_i32_0 : i32, i32
  }
  func.func @transform_10(%arg0: i32) -> (i32, i32) {
    %c0_i32 = arith.constant 0 : i32
    %c0_i32_0 = arith.constant 0 : i32
    %c0_i32_1 = arith.constant 0 : i32
    return %c0_i32, %c0_i32_0 : i32, i32
  }
  func.func @transform_11(%arg0: i32) -> (i32, i32) {
    %c0_i32 = arith.constant 0 : i32
    %c0_i32_0 = arith.constant 0 : i32
    %c0_i32_1 = arith.constant 0 : i32
    return %c0_i32, %c0_i32_0 : i32, i32
  }
  func.func @transform_12(%arg0: i32) -> (i32, i32) {
    %c0_i32 = arith.constant 0 : i32
    %c0_i32_0 = arith.constant 0 : i32
    %c0_i32_1 = arith.constant 0 : i32
    return %c0_i32, %c0_i32_0 : i32, i32
  }
  func.func @transform_13(%arg0: i32) -> (i32, i32) {
    %c0_i32 = arith.constant 0 : i32
    %c0_i32_0 = arith.constant 0 : i32
    return %arg0, %c0_i32 : i32, i32
  }
  func.func @transform_14(%arg0: i32) -> (i32, i32) {
    %c0_i32 = arith.constant 0 : i32
    %c0_i32_0 = arith.constant 0 : i32
    return %arg0, %c0_i32 : i32, i32
  }
}

</mosaic_0001>

<bundles_post_ra>
// kernel: tpu_custom_call.1
= control target key start
LH: loop header
LB: loop body
LE: loop exit
PB: predicated region body
PF: predicated region fallthrough
CT: control target
= control target key end

     0   :  { %21 = vsyncpa [#allocation4], 0  ;;  %s836_s0 = inlined_call_operand.<no memory space> [shape: f32[1,1], index: 0, kind: input, shape index: {}]   ;;  %s837_s1 = inlined_call_operand.hbm [shape: f32[8,32], index: 1, kind: input, shape index: {}]   ;;  %s838_s2 = inlined_call_operand.hbm [shape: f32[8,8], index: 2, kind: input, shape index: {}]   ;;  %s839_s3 = inlined_call_operand.hbm [shape: f32[32,32], index: 3, kind: input, shape index: {}]   ;;  %s840_s4 = inlined_call_operand.hbm [shape: f32[1,32], index: 4, kind: input, shape index: {}]   ;;  %s841_s5 = inlined_call_operand.hbm [shape: f32[32,32], index: 5, kind: input, shape index: {}]   ;;  %s842_s6 = inlined_call_operand.hbm [shape: f32[1,32], index: 6, kind: input, shape index: {}]   ;;  %s843_s7 = inlined_call_operand.vmem [shape: f32[16,16], index: 7, kind: input, shape index: {}]   ;;  %s844_s8 = inlined_call_operand.hbm [shape: f32[1,16], index: 8, kind: input, shape index: {}]   ;;  %s845_s9 = inlined_call_operand.vmem [shape: f32[8,4], index: 9, kind: input, shape index: {}]   ;;  %s846_s10 = inlined_call_operand.vmem [shape: f32[1,4], index: 10, kind: input, shape index: {}]   ;;  %s847_s11 = inlined_call_operand.vmem [shape: f32[4,5], index: 11, kind: input, shape index: {}]   ;;  %s848_s12 = inlined_call_operand.vmem [shape: f32[1,5], index: 12, kind: input, shape index: {}]   ;;  %s849_s13 = inlined_call_operand.hbm [shape: f32[8,5], index: 13, kind: output, shape index: {0}]   ;;  %s850_s14 = inlined_call_operand.hbm [shape: f32[8,8], index: 14, kind: output, shape index: {1}]  }
   0x1   :  { %22 = vsyncpa [#allocation7], 0 }
   0x2   :  { %23 = vsyncpa [#allocation10], 0 }
   0x3   :  { %24 = vsyncpa [#allocation13], 0 }
   0x4   :  { %25 = vsyncpa [#allocation5], 0  ;;  %s45_s15 = sshll.u32 %s838_s2, 4  ;;  %s46_s15 = int_to_ptr.hbm [resolvable:$true] %s45_s15 }
   0x5   :  { %26 = vsyncpa [#allocation17], 0  ;;  %s693_s16 = smov [#allocation6]   ;;  %s69_s20 = sshll.u32 %s840_s4, 4  ;;  %s70_s20 = int_to_ptr.hbm [resolvable:$true] %s69_s20 }
   0x6   :  { %s47_s17 = sshll.u32 %s693_s16, 4  ;;  %s694_s21 = smov [#allocation9]   ;;  %s48_s17 = int_to_ptr.vmem [resolvable:$true] %s47_s17 }
   0x7   :  { %50 = dma.hbm_to_vmem [thread:$0]  %s46_s15, 128, %s48_s17, [#allocation7]  }
   0x8   :  { %s71_s22 = sshll.u32 %s694_s21, 4  ;;  %s93_s25 = sshll.u32 %s842_s6, 4  ;;  %s72_s22 = int_to_ptr.vmem [resolvable:$true] %s71_s22  ;;  %s94_s25 = int_to_ptr.hbm [resolvable:$true] %s93_s25 }
   0x9   :  { %74 = dma.hbm_to_vmem [thread:$0]  %s70_s20, 16, %s72_s22, [#allocation10]  }
   0xa   :  { %s34_s27 = sshll.u32 %s837_s1, 4  ;;  %s695_s28 = smov [#allocation12]   ;;  %s35_s27 = int_to_ptr.hbm [resolvable:$true] %s34_s27 }
   0xb   :  { %s95_s29 = sshll.u32 %s695_s28, 4  ;;  %s696_s4 = smov [#allocation3]   ;;  %s96_s29 = int_to_ptr.vmem [resolvable:$true] %s95_s29 }
   0xc   :  { %98 = dma.hbm_to_vmem [thread:$0]  %s94_s25, 16, %s96_s29, [#allocation13]  }
   0xd   :  { %s36_s30 = sshll.u32 %s696_s4, 4  ;;  %s55_s17 = sshll.u32 %s839_s3, 4  ;;  %s37_s30 = int_to_ptr.vmem [resolvable:$true] %s36_s30  ;;  %s56_s17 = int_to_ptr.hbm [resolvable:$true] %s55_s17 }
   0xe   :  { %39 = dma.hbm_to_vmem [thread:$0]  %s35_s27, 128, %s37_s30, [#allocation4]  }
   0xf   :  { %s697_s6 = smov [#allocation8]   ;;  %s79_s1 = sshll.u32 %s841_s5, 4  ;;  %s80_s1 = int_to_ptr.hbm [resolvable:$true] %s79_s1 }
  0x10   :  { %s57_s18 = sshll.u32 %s697_s6, 4  ;;  %s698_s21 = smov 128   ;;  %s58_s18 = int_to_ptr.vmem [resolvable:$true] %s57_s18 }
  0x11   :  { %s699_s22 = smov 8   ;;  %s700_s23 = smov [#allocation11]  }
  0x12   :  { %63 = dma.hbm_to_vmem [thread:$0]  %s56_s17, 512, %s58_s18, [#allocation7], %s698_s21, %s698_s21, %s699_s22  }
  0x13   :  { %s81_s24 = sshll.u32 %s700_s23, 4  ;;  %s106_s3 = sshll.u32 %s844_s8, 4  ;;  %s82_s24 = int_to_ptr.vmem [resolvable:$true] %s81_s24  ;;  %s107_s3 = int_to_ptr.hbm [resolvable:$true] %s106_s3 }
  0x14   :  { %87 = dma.hbm_to_vmem [thread:$0]  %s80_s1, 512, %s82_s24, [#allocation10], %s698_s21, %s698_s21, %s699_s22  }
  0x15   :  { %s701_s26 = smov [#allocation14]  }
  0x16   :  { %s108_s27 = sshll.u32 %s701_s26, 4  ;;  %s109_s27 = int_to_ptr.vmem [resolvable:$true] %s108_s27 }
  0x17   :  { %111 = dma.hbm_to_vmem [thread:$0]  %s107_s3, 16, %s109_s27, [#allocation13]  }
  0x18   :  { %681 = dma.done.wait [#allocation4], 128  }
  0x19   :  { %682 = vsyncadd [#allocation4], 4294967168 }
  0x1a   :  { %683 = dma.done.wait [#allocation7], 640  }
  0x1b   :  { %684 = vsyncadd [#allocation7], 4294966656 }
  0x1c   :  { %685 = dma.done.wait [#allocation10], 528  }
  0x1d   :  { %686 = vsyncadd [#allocation10], 4294966768 }
  0x1e   :  { %687 = dma.done.wait [#allocation13], 32  }
  0x1f   :  { %688 = vsyncadd [#allocation13], 4294967264  ;;  %v153_v0 = vld [vmem:[#allocation8 + $0x18] sm:$0xff]  ;;  %v152_v1 = vld [vmem:[#allocation8 + $0x10] sm:$0xff]  ;;  %vm158_vm0 = vcmask 261120   ;;  %v806_v9 = vstv %s836_s0  ;;  %s702_s29 = smov 112  }
  0x20   :  { %174 = vmatpush.msra.mxu0 %v153_v0  ;;  %v151_v2 = vld [vmem:[#allocation8 + $0x8] sm:$0xff]  ;;  %v150_v3 = vld [vmem:[#allocation8] sm:$0xff]  ;;  %v149_v4 = vld [vmem:[#allocation3] sm:$0xff]  ;;  %vm268_vm9 = vcmask 130048   ;;  %vm307_vm10 = vcmask 64512   ;;  %vm361_vm11 = vcmask 1043456  }
  0x21   :  { %v446_v5 = vld [vmem:[#allocation9] ss:$0 sm:$0xff]  ;;  %v207_v7 = vld [vmem:[#allocation11 + $0x10] sm:$0xff]  ;;  %v206_v11 = vld [vmem:[#allocation11 + $0x8] sm:$0xff]  ;;  %s406_s1 = sshll.u32 %s850_s14, 4  ;;  %s705_s23 = smov [#allocation15]   ;;  %s407_s1 = int_to_ptr.hbm [resolvable:$true] %s406_s1 }
  0x22   :  { %175 = vmatpush.msra.mxu0 %v152_v1  ;;  %v208_v6 = vld [vmem:[#allocation11 + $0x18] sm:$0xff]  ;;  %v205_v12 = vld [vmem:[#allocation11] sm:$0xff]  ;;  %v262_v37 = vld [vmem:[%s843_s7] sm:$0xff]  ;;  %s393_s24 = sshll.u32 %s705_s23, 4  ;;  %s395_s3 = sshll.u32 %s849_s13, 4  ;;  %s394_s24 = int_to_ptr.vmem [resolvable:$true] %s393_s24  ;;  %s396_s3 = int_to_ptr.hbm [resolvable:$true] %s395_s3 }
  0x23   :  { %228 = vmatpush.msra.mxu1 %v208_v6  ;;  %v263_v29 = vld [vmem:[%s843_s7 + $0x8] sm:$0xff]  ;;  %v447_v30 = vld [vmem:[#allocation12] ss:$0 sm:$0xff]  ;;  %v448_v51 = vld [vmem:[#allocation14] ss:$0 sm:$0xff]  ;;  %s703_s7 = smov 120  }
  0x24   :  { %176 = vmatpush.msra.mxu0 %v151_v2  ;;  %286 = vmatpush.msra.mxu2 %v263_v29  ;;  %v302_v57 = vld [vmem:[%s845_s9] sm:$0xff]  ;;  %v292_v58 = vld [vmem:[#allocation6] sm:$0xff]  ;;  %s704_s9 = smov [#allocation16]  }
  0x25   :  { %229 = vmatpush.msra.mxu1 %v207_v7  ;;  %326 = vmatpush.msra.mxu3 %v302_v57  ;;  %v449_v62 = vld [vmem:[%s846_s10] ss:$0 sm:$0xff]  ;;  %s404_s10 = sshll.u32 %s704_s9, 4  ;;  %s405_s10 = int_to_ptr.vmem [resolvable:$true] %s404_s10 }
  0x26   :  { %177 = vmatpush.msra.mxu0 %v150_v3  ;;  %287 = vmatpush.msra.mxu2 %v262_v37  ;;  %v352_v1 = vld [vmem:[%s847_s11] sm:$0xf] }
  0x27   :  { %424 = vmatmul.msk.f32.vlgmr.msra.gmra.mxu0 %vm158_vm0, %v149_v4  ;;  %230 = vmatpush.msra.mxu1 %v206_v11 }
  0x28   :  { %431 = vmatpush.msk.msrb.mxu3 %vm361_vm11, %v352_v1 }
  0x29   :  { %231 = vmatpush.msra.mxu1 %v205_v12 }
  0xa4   :  { %v179_v8 = vpop.f32.mrf.mxu0 }
  0xa5   :  { %v180_v10 = vadd.f32 %v446_v5, %v179_v8 }
  0xa7   :  { %v183_v13 = vmul.f32 %v806_v9, %v180_v10 }
  0xa9   :  { %v425_v14 = vmul.f32 -1.442695, %v183_v13 }
  0xab   :  { %451 = vpow2.f32 %v425_v14 }
  0xb1   :  { %v452_v15 = vpop.eup %451 }
  0xb2   :  { %v187_v16 = vadd.f32 1.0, %v452_v15 }
  0xb4   :  { %453 = vrcp.f32 %v187_v16  ;;  %v199_v20 = vand.u32 2147483648, %v187_v16  ;;  %v197_v22 = vand.u32 2147483647, %v187_v16  ;;  %vm193_vm2 = vweird.f32 %v187_v16 }
  0xb6   :  { %v200_v24 = vor.u32 1.1754944e-38, %v199_v20  ;;  %vm198_vm4 = vcmp.eq.f32.partialorder %v197_v22, 8.507059e+37 }
  0xba   :  { %v454_v17 = vpop.eup %453 }
  0xbb   :  { %v189_v18 = vmul.f32 %v454_v17, %v187_v16  ;;  %vm194_vm1 = vweird.f32 %v454_v17 }
  0xbc   :  { %vm195_vm3 = vmor %vm193_vm2, %vm194_vm1  ;;  %vm385_vm1 = vcmask 39936  }
  0xbd   :  { %v190_v19 = vsub.f32 1.0, %v189_v18 }
  0xbf   :  { %v191_v21 = vmul.f32 %v454_v17, %v190_v19 }
  0xc1   :  { %v192_v23 = vadd.f32 %v454_v17, %v191_v21 }
  0xc3   :  { %v196_v25 = vsel %vm195_vm3, %v454_v17, %v192_v23  ;;  %v450_v17 = vld [vmem:[%s848_s12] ss:$0 sm:$0xff] }
  0xc4   :  { %v201_v26 = vsel %vm198_vm4, %v200_v24, %v196_v25 }
  0xc5   :  { %v203_v27 = vmul.f32 %v201_v26, %v180_v10 }
  0xc7   :  { %v204_v28 = vadd.f32 %v203_v27, %v149_v4 }
  0xc9   :  { %426 = vmatmul.msk.f32.vlgmr.msra.gmra.mxu1 %vm158_vm0, %v204_v28  ;;  %vm357_vm0 = vcmask 31744  }
 0x146   :  { %v233_v31 = vpop.f32.mrf.mxu1 }
 0x147   :  { %v234_v32 = vadd.f32 %v447_v30, %v233_v31 }
 0x149   :  { %258 = vrot.lane.b32.xlu0 %v234_v32, %s702_s29  ;;  %v236_v33 = vmul.f32 %v234_v32, %v806_v9 }
 0x14b   :  { %v427_v34 = vmul.f32 -1.442695, %v236_v33 }
 0x14d   :  { %455 = vpow2.f32 %v427_v34 }
 0x153   :  { %v456_v35 = vpop.eup %455 }
 0x154   :  { %v240_v36 = vadd.f32 1.0, %v456_v35 }
 0x156   :  { %457 = vrcp.f32 %v240_v36  ;;  %v252_v43 = vand.u32 2147483648, %v240_v36  ;;  %vm246_vm6 = vweird.f32 %v240_v36  ;;  %v250_v44 = vand.u32 2147483647, %v240_v36 }
 0x158   :  { %v253_v46 = vor.u32 1.1754944e-38, %v252_v43  ;;  %vm251_vm8 = vcmp.eq.f32.partialorder %v250_v44, 8.507059e+37 }
 0x15c   :  { %v458_v38 = vpop.eup %457 }
 0x15d   :  { %v242_v39 = vmul.f32 %v458_v38, %v240_v36  ;;  %vm247_vm5 = vweird.f32 %v458_v38 }
 0x15e   :  { %vm248_vm7 = vmor %vm246_vm6, %vm247_vm5 }
 0x15f   :  { %v243_v40 = vsub.f32 1.0, %v242_v39 }
 0x161   :  { %v244_v41 = vmul.f32 %v458_v38, %v243_v40 }
 0x163   :  { %v245_v42 = vadd.f32 %v458_v38, %v244_v41 }
 0x165   :  { %v249_v45 = vsel %vm248_vm7, %v458_v38, %v245_v42 }
 0x166   :  { %v254_v47 = vsel %vm251_vm8, %v253_v46, %v249_v45 }
 0x167   :  { %v256_v48 = vmul.f32 %v254_v47, %v234_v32 }
 0x1bb   :  { %v259_v49 = vpop.permute.xlu0 %258 }
 0x1bc   :  { %v261_v50 = vadd.f32 %v259_v49, %v256_v48 }
 0x1be   :  { %428 = vmatmul.msk.f32.vlgmr.msra.gmra.mxu2 %vm268_vm9, %v261_v50 }
 0x241   :  { %v289_v52 = vpop.f32.mrf.mxu2 }
 0x242   :  { %v290_v53 = vadd.f32 %v448_v51, %v289_v52 }
 0x244   :  { %v293_v54 = vmul.f32 0.5, %v290_v53 }
 0x246   :  { %v294_v55 = vmul.f32 1.442695, %v293_v54 }
 0x248   :  { %459 = vpow2.f32 %v294_v55 }
 0x24e   :  { %v460_v56 = vpop.eup %459 }
 0x24f   :  { %297 = vrot.lane.b32.xlu0 %v460_v56, %s703_s7 }
 0x2c1   :  { %v298_v59 = vpop.permute.xlu0 %297 }
 0x2c2   :  { %v300_v60 = vmul.f32 %v298_v59, %v292_v58 }
 0x2c4   :  { %v301_v61 = vadd.f32 %v300_v60, %v290_v53 }
 0x2c6   :  { %429 = vmatmul.msk.f32.vlgmr.msra.gmra.mxu3 %vm307_vm10, %v301_v61  ;;  %387 = vst.msk [vmem:[#allocation16] sm:$0xff] %vm307_vm10, %v301_v61 }
 0x2c7   :  { %409 = dma.vmem_to_hbm [thread:$0]  %s405_s10, 128, %s407_s1, [#allocation17]  }
 0x349   :  { %v328_v63 = vpop.f32.mrf.mxu3 }
 0x34a   :  { %v329_v0 = vadd.f32 %v449_v62, %v328_v63 }
 0x34c   :  { %v331_v2 = vmul.f32 %v329_v0, %v806_v9 }
 0x34e   :  { %v430_v3 = vmul.f32 -1.442695, %v331_v2 }
 0x350   :  { %461 = vpow2.f32 %v430_v3 }
 0x356   :  { %v462_v4 = vpop.eup %461 }
 0x357   :  { %v335_v5 = vadd.f32 1.0, %v462_v4 }
 0x359   :  { %463 = vrcp.f32 %v335_v5  ;;  %v347_v10 = vand.u32 2147483648, %v335_v5  ;;  %v345_v12 = vand.u32 2147483647, %v335_v5  ;;  %vm341_vm13 = vweird.f32 %v335_v5 }
 0x35b   :  { %v348_v14 = vor.u32 1.1754944e-38, %v347_v10  ;;  %vm346_vm15 = vcmp.eq.f32.partialorder %v345_v12, 8.507059e+37 }
 0x35f   :  { %v464_v6 = vpop.eup %463 }
 0x360   :  { %v337_v7 = vmul.f32 %v464_v6, %v335_v5  ;;  %vm342_vm12 = vweird.f32 %v464_v6 }
 0x361   :  { %vm343_vm14 = vmor %vm341_vm13, %vm342_vm12 }
 0x362   :  { %v338_v8 = vsub.f32 1.0, %v337_v7 }
 0x364   :  { %v339_v11 = vmul.f32 %v464_v6, %v338_v8 }
 0x366   :  { %v340_v13 = vadd.f32 %v464_v6, %v339_v11 }
 0x368   :  { %v344_v15 = vsel %vm343_vm14, %v464_v6, %v340_v13 }
 0x369   :  { %v349_v16 = vsel %vm346_vm15, %v348_v14, %v344_v15 }
 0x36a   :  { %v351_v9 = vmul.f32 %v349_v16, %v329_v0 }
 0x36c   :  { %432 = vmatmul.msk.f32.vlgmr.msrb.gmra.mxu3 %vm357_vm0, %v351_v9 }
 0x3ef   :  { %v382_v18 = vpop.f32.mrf.mxu3 }
 0x3f0   :  { %v383_v19 = vadd.f32 %v450_v17, %v382_v18 }
 0x3f2   :  { %386 = vst.msk [vmem:[#allocation15] sm:$0xff] %vm385_vm1, %v383_v19 }
 0x3f3   :  { %398 = dma.vmem_to_hbm [thread:$0]  %s394_s24, 128, %s396_s3, [#allocation5]  }
 0x3f4   :  { %689 = dma.done.wait [#allocation5], 128  }
 0x3f5   :  { %690 = vsyncadd [#allocation5], 4294967168 }
 0x3f6   :  { %691 = dma.done.wait [#allocation17], 128  }
 0x3f7   :  { %692 = vsyncadd [#allocation17], 4294967168 }
 0x3f8   :  { %418 = vsyncpa [#allocation4], 1 }
 0x3f9   :  { %419 = vsyncpa [#allocation7], 1 }
 0x3fa   :  { %420 = vsyncpa [#allocation10], 1 }
 0x3fb   :  { %421 = vsyncpa [#allocation13], 1 }
 0x3fc   :  { %422 = vsyncpa [#allocation5], 1 }
 0x3fd   :  { %423 = vsyncpa [#allocation17], 1 }

</bundles_post_ra>
